<compile_context>
chip_gen: v5e
topology: v5e:2x2
jax: 0.10.0
libtpu: 0.0.40
codegen_flags: <defaults>
</compile_context>

<pallas_src>
import functools

import jax
import jax.numpy as jnp
from jax import lax
from jax.experimental import pallas as pl
from jax.experimental.pallas import tpu as pltpu


def _round_up(x, m):
    return (x + m - 1) // m * m


def _vmem_capacity_bytes():
    try:
        return int(pltpu.get_tpu_info().vmem_capacity_bytes)
    except Exception:
        return 64 << 20  # conservative fallback: v7x per-TensorCore VMEM


_VMEM_CAP = _vmem_capacity_bytes()
# Generation-aware scoped budget: ~45 MiB on v7x (64 MiB VMEM/TC),
# ~90 MiB on v5e/v6e (128 MiB VMEM).
_VMEM_BUDGET = int(min(_VMEM_CAP * 0.70, 100 << 20))


# ---------------------------------------------------------------------------
# Kernels
# ---------------------------------------------------------------------------
def _linear_kernel(x_ref, w_ref, b_ref, o_ref):
    # x: [tm, K] bf16, w: [K, tc] bf16 (pre-transposed), b: [1, tc] f32,
    # o: [tm, tc] f32 -- MXU matmul with f32 accumulation.
    o_ref[...] = (
        jnp.dot(x_ref[...], w_ref[...], preferred_element_type=jnp.float32)
        + b_ref[...]
    )


def _mean_pool_full_kernel(patch_ref, o_ref, *, inv_n):
    # patch: [tile_b, N, D] (whole token axis in one block), o: [tile_b, D]
    x = patch_ref[...].astype(jnp.float32)
    o_ref[...] = (jnp.sum(x, axis=1) * inv_n).astype(o_ref.dtype)


def _mean_pool_acc_kernel(patch_ref, o_ref, acc_ref, *, inv_n, n_total, tile_n):
    # patch: [tile_b, tile_n, D]; acc: [tile_b, D] f32 scratch; o: [tile_b, D]
    nk = pl.program_id(1)

    @pl.when(nk == 0)
    def _():
        acc_ref[...] = jnp.zeros_like(acc_ref)

    x = patch_ref[...].astype(jnp.float32)
    if n_total % tile_n:  # static branch: mask the ragged final N tile
        tok = lax.broadcasted_iota(jnp.int32, x.shape, dimension=1) + nk * tile_n
        x = jnp.where(tok < n_total, x, 0.0)
    acc_ref[...] += jnp.sum(x, axis=1)

    @pl.when(nk == pl.num_programs(1) - 1)
    def _():
        o_ref[...] = (acc_ref[...] * inv_n).astype(o_ref.dtype)


# ---------------------------------------------------------------------------
# Wrappers
# ---------------------------------------------------------------------------
def mean_pool(patch_tokens, out_dtype=jnp.bfloat16):
    """Mean over the token axis: [B, N, D] -> [B, D] (out_dtype, f32 accumulation)."""
    B, N, D = patch_tokens.shape
    itemsize = jnp.dtype(patch_tokens.dtype).itemsize
    block_budget = 8 << 20  # per input buffer (Pallas double-buffers it)

    rows = block_budget // max(N * D * itemsize, 1)

    # Batch tile: prefer an 8-aligned divisor of B; pad B only if none exists.
    if rows >= B:
        tile_b, b_pad = B, B
    else:
        tile_b = max(8, min((rows // 8) * 8, 1024))
        while tile_b > 8 and B % tile_b:
            tile_b -= 8
        if B % tile_b:
            b_pad = _round_up(B, tile_b)
            patch_tokens = jnp.pad(patch_tokens, ((0, b_pad - B), (0, 0), (0, 0)))
        else:
            b_pad = B

    whole_n = (tile_b * N * D * itemsize) <= (16 << 20)

    if whole_n:
        block_bytes = tile_b * N * D * itemsize
        vmem_limit = int(min(max(2 * block_bytes + (4 << 20), 16 << 20),
                             max(_VMEM_CAP - (2 << 20), 16 << 20)))
        kernel = functools.partial(_mean_pool_full_kernel, inv_n=1.0 / float(N))
        out = pl.pallas_call(
            kernel,
            out_shape=jax.ShapeDtypeStruct((b_pad, D), out_dtype),
            grid=(b_pad // tile_b,),
            in_specs=[pl.BlockSpec((tile_b, N, D), lambda i: (i, 0, 0))],
            out_specs=pl.BlockSpec((tile_b, D), lambda i: (i, 0)),
            compiler_params=pltpu.CompilerParams(
                dimension_semantics=("parallel",),
                vmem_limit_bytes=vmem_limit),
        )(patch_tokens)
    else:
        # One row-group does not fit: tile the token axis, accumulate in f32 scratch.
        tile_n = (block_budget // max(tile_b * D * itemsize, 1)) // 8 * 8
        tile_n = max(8, min(tile_n, max(8, (N // 8) * 8)))
        block_bytes = tile_b * tile_n * D * itemsize
        vmem_limit = int(min(max(2 * block_bytes + (4 << 20), 16 << 20),
                             max(_VMEM_CAP - (2 << 20), 16 << 20)))
        kernel = functools.partial(
            _mean_pool_acc_kernel, inv_n=1.0 / float(N), n_total=N, tile_n=tile_n)
        out = pl.pallas_call(
            kernel,
            out_shape=jax.ShapeDtypeStruct((b_pad, D), out_dtype),
            grid=(b_pad // tile_b, pl.cdiv(N, tile_n)),
            in_specs=[pl.BlockSpec((tile_b, tile_n, D), lambda i, k: (i, k, 0))],
            out_specs=pl.BlockSpec((tile_b, D), lambda i, k: (i, 0)),
            scratch_shapes=[pltpu.VMEM((tile_b, D), jnp.float32)],
            compiler_params=pltpu.CompilerParams(
                dimension_semantics=("parallel", "arbitrary"),
                vmem_limit_bytes=vmem_limit),
        )(patch_tokens)

    return out[:B] if b_pad != B else out


def linear(x_bf16, weight_t, bias_p):
    """y = x @ weight_t + bias.  weight_t: [K, C_pad] bf16 (pre-transposed),
    bias_p: [1, C_pad] f32.  Returns f32 [B, C_pad]."""
    B, K = x_bf16.shape
    K2, C_pad = weight_t.shape
    assert K == K2 and C_pad % 128 == 0

    # Batch tiling: pad B instead of shrinking tile_m to tiny divisors.
    if B % 256 == 0:
        tile_m = 256
    elif B >= 128:
        tile_m = 128
    else:
        tile_m = _round_up(B, 16)  # single M tile, bf16-sublane aligned
    b_pad = _round_up(B, tile_m)
    if b_pad != B:
        x_bf16 = jnp.pad(x_bf16, ((0, b_pad - B), (0, 0)))

    def vmem_need(tc):
        return (2 * K * tc * 2            # weight tiles (bf16, double-buffered)
                + 2 * tile_m * K * 2      # x tiles (bf16, double-buffered)
                + 2 * tile_m * tc * 4     # out tiles (f32, double-buffered)
                + 2 * tc * 4              # bias
                + (1 << 20))              # slack

    w_resident = vmem_need(C_pad) <= _VMEM_BUDGET

    if w_resident:
        # Whole weight held in VMEM (constant block index -> fetched from HBM
        # exactly once); only the x / out tiles stream. Grid over batch only.
        grid = (b_pad // tile_m,)
        in_specs = [
            pl.BlockSpec((tile_m, K), lambda i: (i, 0)),
            pl.BlockSpec((K, C_pad), lambda i: (0, 0)),
            pl.BlockSpec((1, C_pad), lambda i: (0, 0)),
        ]
        out_specs = pl.BlockSpec((tile_m, C_pad), lambda i: (i, 0))
        semantics = ("parallel",)
        x_reads = 1
        vmem_limit = vmem_need(C_pad)
    else:
        # Class axis OUTER, batch INNER: each [K, tile_c] weight block is held
        # across the whole batch sweep -> weight streamed from HBM once total.
        tile_c = 128
        for cand in (4096, 2048, 1024, 512, 256, 128):
            if cand <= C_pad and C_pad % cand == 0 and vmem_need(cand) <= _VMEM_BUDGET:
                tile_c = cand
                break
        # TODO(synk): add a K grid axis with an f32 accumulator when even
        # tile_c=128 exceeds the VMEM budget (very large K on v7x).
        grid = (C_pad // tile_c, b_pad // tile_m)
        in_specs = [
            pl.BlockSpec((tile_m, K), lambda j, i: (i, 0)),
            pl.BlockSpec((K, tile_c), lambda j, i: (0, j)),
            pl.BlockSpec((1, tile_c), lambda j, i: (0, j)),
        ]
        out_specs = pl.BlockSpec((tile_m, tile_c), lambda j, i: (i, j))
        semantics = ("parallel", "parallel")
        x_reads = C_pad // tile_c
        vmem_limit = vmem_need(tile_c)

    vmem_limit = int(min(max(vmem_limit, 16 << 20),
                         max(_VMEM_CAP - (2 << 20), 16 << 20)))

    cost = pl.CostEstimate(
        flops=2 * b_pad * K * C_pad,
        transcendentals=0,
        bytes_accessed=(x_reads * b_pad * K * 2  # x streamed once per class tile
                        + K * C_pad * 2          # weight streamed exactly once
                        + C_pad * 4              # bias
                        + b_pad * C_pad * 4),    # output write
    )

    out = pl.pallas_call(
        _linear_kernel,
        out_shape=jax.ShapeDtypeStruct((b_pad, C_pad), jnp.float32),
        grid=grid,
        in_specs=in_specs,
        out_specs=out_specs,
        compiler_params=pltpu.CompilerParams(
            dimension_semantics=semantics,
            vmem_limit_bytes=vmem_limit),
        cost_estimate=cost,
    )(x_bf16, weight_t, bias_p)

    return out[:B] if b_pad != B else out


def create_linear_input(x_tokens_list, use_n_blocks, use_avgpool):
    # Feature path kept end-to-end in bf16 (f32 accumulation inside kernels).
    # Documented deviation from torch's f32 contract (linear-probe use case).
    intermediate_output = x_tokens_list[-use_n_blocks:]
    feats = [class_token.astype(jnp.bfloat16)
             for _, class_token in intermediate_output]
    if use_avgpool:
        feats.append(mean_pool(intermediate_output[-1][0], out_dtype=jnp.bfloat16))
    output = jnp.concatenate(feats, axis=-1)
    return output.reshape(output.shape[0], -1)


def _forward_impl(x_tokens_list, weight_t, bias_p, *, use_n_blocks,
                  use_avgpool, num_classes):
    feats = create_linear_input(x_tokens_list, use_n_blocks, use_avgpool)
    logits = linear(feats, weight_t, bias_p)     # [B, C_pad] f32
    return logits[:, :num_classes]


class LinearClassifier:
    """Linear layer to train on top of frozen features (JAX/Pallas version)."""

    def __init__(self, out_dim, use_n_blocks, use_avgpool, num_classes=1000,
                 key=None):
        if key is None:
            key = jax.random.PRNGKey(0)
        self.out_dim = out_dim
        self.use_n_blocks = use_n_blocks
        self.use_avgpool = use_avgpool
        self.num_classes = num_classes

        c_pad = _round_up(num_classes, 128)
        # torch-matching init: weight ~ N(0, 0.01), bias = 0.
        w = 0.01 * jax.random.normal(key, (num_classes, out_dim),
                                     dtype=jnp.float32)
        w_t = jnp.zeros((out_dim, c_pad), jnp.float32).at[:, :num_classes].set(w.T)
        # Weight stored once: pre-transposed, class-padded to 128, bf16.
        self.weight_t = w_t.astype(jnp.bfloat16)           # [K, C_pad]
        self.bias_p = jnp.zeros((1, c_pad), jnp.float32)    # [1, C_pad]

        self._forward = jax.jit(functools.partial(
            _forward_impl,
            use_n_blocks=use_n_blocks,
            use_avgpool=use_avgpool,
            num_classes=num_classes))

    def __call__(self, x_tokens_list):
        return self._forward(x_tokens_list, self.weight_t, self.bias_p)


# ---------------------------------------------------------------------------
# Demo / smoke test
# ---------------------------------------------------------------------------
if __name__ == "__main__":
    key = jax.random.PRNGKey(0)

    B, N, D = 8, 16, 32          # batch, patch tokens, feature dim
    n_total_blocks = 4
    use_n_blocks = 2
    use_avgpool = True
    num_classes = 256

    keys = jax.random.split(key, 2 * n_total_blocks + 1)
    x_tokens_list = []
    for blk in range(n_total_blocks):
        patch = jax.random.normal(keys[2 * blk], (B, N, D), dtype=jnp.float32)
        cls = jax.random.normal(keys[2 * blk + 1], (B, D), dtype=jnp.float32)
        x_tokens_list.append((patch, cls))

    out_dim = use_n_blocks * D + (D if use_avgpool else 0)
    clf = LinearClassifier(out_dim, use_n_blocks, use_avgpool,
                           num_classes=num_classes, key=keys[-1])

    logits = clf(x_tokens_list)
    jax.block_until_ready(logits)

    # Reference in plain JAX with the same precision contract
    # (bf16 features / weights, f32 accumulation).
    inter = x_tokens_list[-use_n_blocks:]
    feats = [ct.astype(jnp.bfloat16) for _, ct in inter]
    if use_avgpool:
        feats.append(jnp.mean(inter[-1][0].astype(jnp.float32),
                              axis=1).astype(jnp.bfloat16))
    x_ref = jnp.concatenate(feats, axis=-1)
    ref = (jnp.dot(x_ref, clf.weight_t[:, :num_classes],
                   preferred_element_type=jnp.float32)
           + clf.bias_p[0, :num_classes])

    assert logits.shape == (B, num_classes)
    assert jnp.allclose(logits, ref, atol=2e-2, rtol=2e-2)

    print("KERNEL_OK")
</pallas_src>

<mosaic_0001>
module attributes {stable_mosaic.version = 11 : i64} {
  func.func @_mean_pool_full_kernel(%arg0: i32, %arg1: memref<8x16x32xf32, #tpu.memory_space<vmem>>, %arg2: memref<8x32xbf16, #tpu.memory_space<vmem>>) attributes {dimension_semantics = [#tpu.dimension_semantics<parallel>], iteration_bounds = array<i64: 1>, scalar_prefetch = 0 : i64, scratch_operands = 0 : i64, tpu.core_type = #tpu.core_type<tc>, window_params = [{transform_indices = @transform_0, window_bounds = array<i64: 8, 16, 32>}, {transform_indices = @transform_1, window_bounds = array<i64: 8, 32>}]} {
    %c0 = arith.constant 0 : index
    %c0_0 = arith.constant 0 : index
    %c0_1 = arith.constant 0 : index
    %0 = vector.load %arg1[%c0, %c0_0, %c0_1] : memref<8x16x32xf32, #tpu.memory_space<vmem>>, vector<8x16x32xf32>
    %cst = arith.constant dense<0.000000e+00> : vector<8x32xf32>
    %1 = vector.multi_reduction <add>, %0, %cst [1] : vector<8x16x32xf32> to vector<8x32xf32>
    %cst_2 = arith.constant 6.250000e-02 : f32
    %2 = vector.broadcast %cst_2 : f32 to vector<8x32xf32>
    %3 = arith.mulf %1, %2 : vector<8x32xf32>
    %4 = arith.truncf %3 : vector<8x32xf32> to vector<8x32xbf16>
    %c0_3 = arith.constant 0 : index
    %c0_4 = arith.constant 0 : index
    %5 = vector.load %arg2[%c0_3, %c0_4] : memref<8x32xbf16, #tpu.memory_space<vmem>>, vector<8x32xbf16>
    tpu.vector_store %arg2[%c0_3, %c0_4], %4 {strides = array<i32>} : memref<8x32xbf16, #tpu.memory_space<vmem>>, vector<8x32xbf16>,
    return
  }
  func.func @transform_0(%arg0: i32) -> (i32, i32, i32) {
    %c0_i32 = arith.constant 0 : i32
    %c0_i32_0 = arith.constant 0 : i32
    %c0_i32_1 = arith.constant 0 : i32
    return %arg0, %c0_i32, %c0_i32_0 : i32, i32, i32
  }
  func.func @transform_1(%arg0: i32) -> (i32, i32) {
    %c0_i32 = arith.constant 0 : i32
    %c0_i32_0 = arith.constant 0 : i32
    return %arg0, %c0_i32 : i32, i32
  }
}

module attributes {stable_mosaic.version = 11 : i64} {
  func.func @_linear_kernel(%arg0: i32, %arg1: memref<16x96xbf16, #tpu.memory_space<vmem>>, %arg2: memref<96x256xbf16, #tpu.memory_space<vmem>>, %arg3: memref<1x256xf32, #tpu.memory_space<vmem>>, %arg4: memref<16x256xf32, #tpu.memory_space<vmem>>) attributes {dimension_semantics = [#tpu.dimension_semantics<parallel>], iteration_bounds = array<i64: 1>, scalar_prefetch = 0 : i64, scratch_operands = 0 : i64, tpu.core_type = #tpu.core_type<tc>, window_params = [{transform_indices = @transform_0, window_bounds = array<i64: 16, 96>}, {pipeline_mode = #tpu.pipeline_mode<synchronous>, transform_indices = @transform_1, window_bounds = array<i64: 96, 256>}, {pipeline_mode = #tpu.pipeline_mode<synchronous>, transform_indices = @transform_2, window_bounds = array<i64: 1, 256>}, {transform_indices = @transform_3, window_bounds = array<i64: 16, 256>}]} {
    %c0 = arith.constant 0 : index
    %c0_0 = arith.constant 0 : index
    %0 = vector.load %arg1[%c0, %c0_0] : memref<16x96xbf16, #tpu.memory_space<vmem>>, vector<16x96xbf16>
    %c0_1 = arith.constant 0 : index
    %c0_2 = arith.constant 0 : index
    %1 = vector.load %arg2[%c0_1, %c0_2] : memref<96x256xbf16, #tpu.memory_space<vmem>>, vector<96x256xbf16>
    %cst = arith.constant dense<0.000000e+00> : vector<16x256xf32>
    %2 = tpu.matmul %0, %1, %cst {dimension_numbers = #tpu.dot_dimension_numbers<[1], [0], [0], [1], [0, 0, 1, 1], [], []>} : vector<16x96xbf16>, vector<96x256xbf16>, vector<16x256xf32> -> vector<16x256xf32>
    %c0_3 = arith.constant 0 : index
    %c0_4 = arith.constant 0 : index
    %3 = vector.load %arg3[%c0_3, %c0_4] : memref<1x256xf32, #tpu.memory_space<vmem>>, vector<1x256xf32>
    %4 = vector.broadcast %3 : vector<1x256xf32> to vector<16x256xf32>
    %5 = arith.addf %2, %4 : vector<16x256xf32>
    %c0_5 = arith.constant 0 : index
    %c0_6 = arith.constant 0 : index
    %6 = vector.load %arg4[%c0_5, %c0_6] : memref<16x256xf32, #tpu.memory_space<vmem>>, vector<16x256xf32>
    tpu.vector_store %arg4[%c0_5, %c0_6], %5 {strides = array<i32>} : memref<16x256xf32, #tpu.memory_space<vmem>>, vector<16x256xf32>,
    return
  }
  func.func @transform_0(%arg0: i32) -> (i32, i32) {
    %c0_i32 = arith.constant 0 : i32
    %c0_i32_0 = arith.constant 0 : i32
    return %arg0, %c0_i32 : i32, i32
  }
  func.func @transform_1(%arg0: i32) -> (i32, i32) {
    %c0_i32 = arith.constant 0 : i32
    %c0_i32_0 = arith.constant 0 : i32
    %c0_i32_1 = arith.constant 0 : i32
    return %c0_i32, %c0_i32_0 : i32, i32
  }
  func.func @transform_2(%arg0: i32) -> (i32, i32) {
    %c0_i32 = arith.constant 0 : i32
    %c0_i32_0 = arith.constant 0 : i32
    %c0_i32_1 = arith.constant 0 : i32
    return %c0_i32, %c0_i32_0 : i32, i32
  }
  func.func @transform_3(%arg0: i32) -> (i32, i32) {
    %c0_i32 = arith.constant 0 : i32
    %c0_i32_0 = arith.constant 0 : i32
    return %arg0, %c0_i32 : i32, i32
  }
}

</mosaic_0001>

<bundles_post_ra>
// kernel: _forward_impl.2
= control target key start
LH: loop header
LB: loop body
LE: loop exit
PB: predicated region body
PF: predicated region fallthrough
CT: control target
= control target key end

     0   :  { %6 = vsyncpa [#allocation3], 0  ;;  %s197_s9 = smov [#allocation2]   ;;  %s198_s11 = smov 128   ;;  %s234_s0 = inlined_call_operand.hbm [shape: f32[8,16,32], index: 0, kind: input, shape index: {}]   ;;  %s235_s1 = inlined_call_operand.vmem [shape: bf16[8,32], index: 1, kind: output, shape index: {}]  }
   0x1   :  { %s11_s8 = sshll.u32 %s234_s0, 4  ;;  %s13_s10 = sshll.u32 %s197_s9, 4  ;;  %s12_s8 = int_to_ptr.hbm [resolvable:$true] %s11_s8  ;;  %s14_s10 = int_to_ptr.vmem [resolvable:$true] %s13_s10 }
   0x2   :  { %s199_s12 = smov 8  }
   0x3   :  { %19 = dma.hbm_to_vmem [thread:$0]  %s12_s8, 2048, %s14_s10, [#allocation3], %s198_s11, %s198_s11, %s199_s12  }
   0x4   :  { %195 = dma.done.wait [#allocation3], 2048  }
   0x5   :  { %196 = vsyncadd [#allocation3], 4294965248  ;;  %vm40_vm0 = vcmask 261120   ;;  %v24_v0 = vld [vmem:[#allocation2] sm:$0xff]  ;;  %v25_v1 = vld [vmem:[#allocation2 + $0x8] sm:$0xff]  ;;  %vm145_vm1 = vcmask 1041409  }
   0x6   :  { %v26_v2 = vld [vmem:[#allocation2 + $0x10] sm:$0xff]  ;;  %v27_v3 = vld [vmem:[#allocation2 + $0x18] sm:$0xff]  ;;  %v28_v4 = vld [vmem:[#allocation2 + $0x20] sm:$0xff]  ;;  %v41_v6 = vsel %vm40_vm0, %v24_v0, 0.0  ;;  %v42_v7 = vsel %vm40_vm0, %v25_v1, 0.0  ;;  %vm147_vm2 = vcmask 1042434  }
   0x7   :  { %v29_v5 = vld [vmem:[#allocation2 + $0x28] sm:$0xff]  ;;  %v50_v8 = vsel %vm40_vm0, %v26_v2, 0.0  ;;  %v30_v9 = vld [vmem:[#allocation2 + $0x30] sm:$0xff]  ;;  %v31_v10 = vld [vmem:[#allocation2 + $0x38] sm:$0xff]  ;;  %v43_v12 = vadd.f32 %v42_v7, %v41_v6  ;;  %v51_v13 = vsel %vm40_vm0, %v27_v3, 0.0  ;;  %v59_v14 = vsel %vm40_vm0, %v28_v4, 0.0 }
   0x8   :  { %v32_v11 = vld [vmem:[#allocation2 + $0x40] sm:$0xff]  ;;  %v60_v15 = vsel %vm40_vm0, %v29_v5, 0.0  ;;  %v33_v16 = vld [vmem:[#allocation2 + $0x48] sm:$0xff]  ;;  %v34_v17 = vld [vmem:[#allocation2 + $0x50] sm:$0xff]  ;;  %v52_v19 = vadd.f32 %v51_v13, %v50_v8  ;;  %v68_v21 = vsel %vm40_vm0, %v30_v9, 0.0  ;;  %v69_v22 = vsel %vm40_vm0, %v31_v10, 0.0 }
   0x9   :  { %v35_v18 = vld [vmem:[#allocation2 + $0x58] sm:$0xff]  ;;  %v61_v20 = vadd.f32 %v60_v15, %v59_v14  ;;  %v36_v23 = vld [vmem:[#allocation2 + $0x60] sm:$0xff]  ;;  %v44_v24 = vrot.slane %v43_v12, 4  ;;  %v70_v25 = vadd.f32 %v69_v22, %v68_v21  ;;  %v77_v26 = vsel %vm40_vm0, %v32_v11, 0.0  ;;  %v37_v28 = vld [vmem:[#allocation2 + $0x68] sm:$0xff] }
   0xa   :  { %v78_v27 = vsel %vm40_vm0, %v33_v16, 0.0  ;;  %v38_v29 = vld [vmem:[#allocation2 + $0x70] sm:$0xff]  ;;  %v53_v30 = vrot.slane %v52_v19, 4  ;;  %v86_v33 = vsel %vm40_vm0, %v34_v17, 0.0  ;;  %v87_v36 = vsel %vm40_vm0, %v35_v18, 0.0  ;;  %v39_v38 = vld [vmem:[#allocation2 + $0x78] sm:$0xff] }
   0xb   :  { %v62_v31 = vrot.slane %v61_v20, 4  ;;  %v79_v32 = vadd.f32 %v78_v27, %v77_v26  ;;  %v45_v34 = vadd.f32 %v44_v24, %v43_v12  ;;  %v71_v35 = vrot.slane %v70_v25, 4 }
   0xc   :  { %v95_v37 = vsel %vm40_vm0, %v36_v23, 0.0  ;;  %v54_v39 = vadd.f32 %v53_v30, %v52_v19  ;;  %v88_v42 = vadd.f32 %v87_v36, %v86_v33  ;;  %v96_v45 = vsel %vm40_vm0, %v37_v28, 0.0 }
   0xd   :  { %v63_v40 = vadd.f32 %v62_v31, %v61_v20  ;;  %v80_v41 = vrot.slane %v79_v32, 4  ;;  %v46_v43 = vrot.slane %v45_v34, 2  ;;  %v72_v44 = vadd.f32 %v71_v35, %v70_v25 }
   0xe   :  { %v104_v46 = vsel %vm40_vm0, %v38_v29, 0.0  ;;  %v55_v47 = vrot.slane %v54_v39, 2  ;;  %v89_v50 = vrot.slane %v88_v42, 4  ;;  %v97_v53 = vadd.f32 %v96_v45, %v95_v37 }
   0xf   :  { %v64_v48 = vrot.slane %v63_v40, 2  ;;  %v81_v49 = vadd.f32 %v80_v41, %v79_v32  ;;  %v47_v51 = vadd.f32 %v46_v43, %v45_v34  ;;  %v73_v52 = vrot.slane %v72_v44, 2 }
  0x10   :  { %v105_v54 = vsel %vm40_vm0, %v39_v38, 0.0  ;;  %v56_v55 = vadd.f32 %v55_v47, %v54_v39  ;;  %v90_v58 = vadd.f32 %v89_v50, %v88_v42  ;;  %v98_v61 = vrot.slane %v97_v53, 4 }
  0x11   :  { %v65_v56 = vadd.f32 %v64_v48, %v63_v40  ;;  %v82_v57 = vrot.slane %v81_v49, 2  ;;  %v48_v59 = vrot.slane %v47_v51, 1  ;;  %v74_v60 = vadd.f32 %v73_v52, %v72_v44 }
  0x12   :  { %v106_v62 = vadd.f32 %v105_v54, %v104_v46  ;;  %v57_v63 = vrot.slane %v56_v55, 1  ;;  %v91_v2 = vrot.slane %v90_v58, 2  ;;  %v99_v5 = vadd.f32 %v98_v61, %v97_v53 }
  0x13   :  { %v66_v0 = vrot.slane %v65_v56, 1  ;;  %v83_v1 = vadd.f32 %v82_v57, %v81_v49  ;;  %v49_v3 = vadd.f32 %v48_v59, %v47_v51  ;;  %v75_v4 = vrot.slane %v74_v60, 1 }
  0x14   :  { %v107_v6 = vrot.slane %v106_v62, 4  ;;  %v58_v7 = vadd.f32 %v57_v63, %v56_v55  ;;  %v92_v10 = vadd.f32 %v91_v2, %v90_v58  ;;  %v100_v12 = vrot.slane %v99_v5, 2 }
  0x15   :  { %v67_v8 = vadd.f32 %v66_v0, %v65_v56  ;;  %v84_v9 = vrot.slane %v83_v1, 1  ;;  %v76_v11 = vadd.f32 %v75_v4, %v74_v60  ;;  %v113_v14 = vmul.f32 0.0625, %v49_v3 }
  0x16   :  { %v108_v13 = vadd.f32 %v107_v6, %v106_v62  ;;  %v93_v16 = vrot.slane %v92_v10, 1  ;;  %v114_v17 = vmul.f32 0.0625, %v58_v7  ;;  %v101_v19 = vadd.f32 %v100_v12, %v99_v5 }
  0x17   :  { %v85_v15 = vadd.f32 %v84_v9, %v83_v1  ;;  %v115_v18 = vmul.f32 0.0625, %v67_v8  ;;  %v116_v21 = vmul.f32 0.0625, %v76_v11  ;;  %v121_v22 = vpack.c.bf16 %v113_v14, %v113_v14 }
  0x18   :  { %v109_v20 = vrot.slane %v108_v13, 2  ;;  %v94_v23 = vadd.f32 %v93_v16, %v92_v10  ;;  %v122_v25 = vpack.c.bf16 %v114_v17, %v114_v17  ;;  %v102_v27 = vrot.slane %v101_v19, 1 }
  0x19   :  { %v117_v24 = vmul.f32 0.0625, %v85_v15  ;;  %v123_v26 = vpack.c.bf16 %v115_v18, %v115_v18  ;;  %v124_v29 = vpack.c.bf16 %v116_v21, %v116_v21  ;;  %v137_v30 = vunpack.c.l.b16 %v121_v22 }
  0x1a   :  { %v110_v28 = vadd.f32 %v109_v20, %v108_v13  ;;  %v118_v31 = vmul.f32 0.0625, %v94_v23  ;;  %v138_v33 = vunpack.c.l.b16 %v122_v25  ;;  %v103_v35 = vadd.f32 %v102_v27, %v101_v19 }
  0x1b   :  { %v125_v32 = vpack.c.bf16 %v117_v24, %v117_v24  ;;  %v139_v34 = vunpack.c.l.b16 %v123_v26  ;;  %v140_v37 = vunpack.c.l.b16 %v124_v29  ;;  %vm149_vm3 = vcmask 1043459  }
  0x1c   :  { %v111_v36 = vrot.slane %v110_v28, 1  ;;  %v126_v38 = vpack.c.bf16 %v118_v31, %v118_v31  ;;  %v146_v40 = vsel %vm145_vm1, %v138_v33, %v137_v30  ;;  %vm151_vm4 = vcmask 1044484  }
  0x1d   :  { %v141_v39 = vunpack.c.l.b16 %v125_v32  ;;  %v119_v42 = vmul.f32 0.0625, %v103_v35  ;;  %v148_v43 = vsel %vm147_vm2, %v139_v34, %v146_v40  ;;  %vm153_vm5 = vcmask 1045509  }
  0x1e   :  { %v112_v41 = vadd.f32 %v111_v36, %v110_v28  ;;  %v142_v44 = vunpack.c.l.b16 %v126_v38  ;;  %v150_v45 = vsel %vm149_vm3, %v140_v37, %v148_v43  ;;  %vm155_vm6 = vcmask 1046534  }
  0x1f   :  { %v127_v47 = vpack.c.bf16 %v119_v42, %v119_v42  ;;  %v152_v48 = vsel %vm151_vm4, %v141_v39, %v150_v45  ;;  %vm157_vm7 = vcmask 1047559   ;;  %vm161_vm8 = vcmask 257024  }
  0x20   :  { %v120_v46 = vmul.f32 0.0625, %v112_v41  ;;  %v154_v49 = vsel %vm153_vm5, %v142_v44, %v152_v48 }
  0x21   :  { %v143_v51 = vunpack.c.l.b16 %v127_v47 }
  0x22   :  { %v128_v50 = vpack.c.bf16 %v120_v46, %v120_v46 }
  0x23   :  { %v156_v53 = vsel %vm155_vm6, %v143_v51, %v154_v49 }
  0x24   :  { %v144_v52 = vunpack.c.l.b16 %v128_v50 }
  0x26   :  { %v158_v54 = vsel %vm157_vm7, %v144_v52, %v156_v53 }
  0x27   :  { %v159_v55 = vpack.c.b16 %v158_v54, %v158_v54 }
  0x29   :  { %162 = vst.msk [vmem:[%s235_s1] sm:$0xf] %vm161_vm8, %v159_v55 }
  0x2a   :  { %167 = vsyncpa [#allocation3], 1 }

// kernel: _forward_impl.3
= control target key start
LH: loop header
LB: loop body
LE: loop exit
PB: predicated region body
PF: predicated region fallthrough
CT: control target
= control target key end

     0   :  { %8 = vsyncpa [#allocation3], 0  ;;  %s253_s15 = smov [#allocation2]   ;;  %s254_s17 = smov 128   ;;  %s297_s0 = inlined_call_operand.vmem [shape: bf16[16,96], index: 0, kind: input, shape index: {}]   ;;  %s298_s1 = inlined_call_operand.hbm [shape: bf16[96,256], index: 1, kind: input, shape index: {}]   ;;  %s299_s2 = inlined_call_operand.vmem [shape: f32[1,256], index: 2, kind: input, shape index: {}]   ;;  %s300_s3 = inlined_call_operand.vmem [shape: f32[16,256], index: 3, kind: output, shape index: {}]  }
   0x1   :  { %s15_s14 = sshll.u32 %s298_s1, 4  ;;  %s17_s16 = sshll.u32 %s253_s15, 4  ;;  %s16_s14 = int_to_ptr.hbm [resolvable:$true] %s15_s14  ;;  %s18_s16 = int_to_ptr.vmem [resolvable:$true] %s17_s16 }
   0x2   :  { %s255_s18 = smov 8  }
   0x3   :  { %23 = dma.hbm_to_vmem [thread:$0]  %s16_s14, 1536, %s18_s16, [#allocation3], %s254_s17, %s254_s17, %s255_s18  }
   0x4   :  { %251 = dma.done.wait [#allocation3], 1536  }
   0x5   :  { %252 = vsyncadd [#allocation3], 4294965760  ;;  %v203_v0 = vld [vmem:[#allocation2 + $0x50] sm:$0xf]  ;;  %v223_v1 = vld [vmem:[#allocation2 + $0x54] sm:$0xf0] }
   0x6   :  { %v222_v2 = vld [vmem:[#allocation2 + $0x54] sm:$0xf]  ;;  %v204_v3 = vor.u32 %v223_v1, %v203_v0  ;;  %v205_v4 = vld [vmem:[#allocation2 + $0x58] sm:$0xf0]  ;;  %v195_v5 = vld [vmem:[#allocation2 + $0x40] sm:$0xf] }
   0x7   :  { %v221_v6 = vld [vmem:[#allocation2 + $0x44] sm:$0xf0]  ;;  %v208_v7 = vor.u32 %v222_v2, %v205_v4  ;;  %v220_v8 = vld [vmem:[#allocation2 + $0x44] sm:$0xf]  ;;  %v197_v9 = vld [vmem:[#allocation2 + $0x48] sm:$0xf0] }
   0x8   :  { %122 = vmatpush.bf16.msra.mxu0 %v204_v3  ;;  %v196_v10 = vor.u32 %v221_v6, %v195_v5  ;;  %v200_v11 = vor.u32 %v220_v8, %v197_v9  ;;  %v187_v12 = vld [vmem:[#allocation2 + $0x30] sm:$0xf]  ;;  %v219_v13 = vld [vmem:[#allocation2 + $0x34] sm:$0xf0]  ;;  %v218_v14 = vld [vmem:[#allocation2 + $0x34] sm:$0xf] }
   0x9   :  { %136 = vmatpush.bf16.msra.mxu1 %v208_v7  ;;  %v189_v15 = vld [vmem:[#allocation2 + $0x38] sm:$0xf0]  ;;  %v188_v16 = vor.u32 %v219_v13, %v187_v12  ;;  %v179_v18 = vld [vmem:[#allocation2 + $0x20] sm:$0xf]  ;;  %v217_v19 = vld [vmem:[#allocation2 + $0x24] sm:$0xf0] }
   0xa   :  { %v192_v17 = vor.u32 %v218_v14, %v189_v15  ;;  %v216_v20 = vld [vmem:[#allocation2 + $0x24] sm:$0xf]  ;;  %v181_v21 = vld [vmem:[#allocation2 + $0x28] sm:$0xf0]  ;;  %v180_v22 = vor.u32 %v217_v19, %v179_v18  ;;  %v171_v24 = vld [vmem:[#allocation2 + $0x10] sm:$0xf] }
   0xb   :  { %v184_v23 = vor.u32 %v216_v20, %v181_v21  ;;  %v215_v25 = vld [vmem:[#allocation2 + $0x14] sm:$0xf0]  ;;  %v214_v26 = vld [vmem:[#allocation2 + $0x14] sm:$0xf]  ;;  %v173_v27 = vld [vmem:[#allocation2 + $0x18] sm:$0xf0] }
   0xc   :  { %123 = vmatpush.bf16.msra.mxu0 %v196_v10  ;;  %v172_v28 = vor.u32 %v215_v25, %v171_v24  ;;  %v176_v29 = vor.u32 %v214_v26, %v173_v27  ;;  %v163_v30 = vld [vmem:[#allocation2] sm:$0xf]  ;;  %v213_v31 = vld [vmem:[#allocation2 + $0x4] sm:$0xf0]  ;;  %v212_v32 = vld [vmem:[#allocation2 + $0x4] sm:$0xf] }
   0xd   :  { %137 = vmatpush.bf16.msra.mxu1 %v200_v11  ;;  %v165_v33 = vld [vmem:[#allocation2 + $0x8] sm:$0xf0]  ;;  %v164_v34 = vor.u32 %v213_v31, %v163_v30  ;;  %v211_v36 = vld [vmem:[%s297_s0] sm:$0xff]  ;;  %vm116_vm0 = vcmask 785408  }
   0xe   :  { %v168_v35 = vor.u32 %v212_v32, %v165_v33  ;;  %v45_v37 = vld [vmem:[%s299_s2] sm:$0x3] }
   0xf   :  { %v47_v38 = vperm.slane %v45_v37, 0  ;;  %v48_v39 = vperm.slane %v45_v37, 1 }
  0x10   :  { %124 = vmatpush.bf16.msra.mxu0 %v188_v16 }
  0x11   :  { %138 = vmatpush.bf16.msra.mxu1 %v192_v17 }
  0x14   :  { %125 = vmatpush.bf16.msra.mxu0 %v180_v22 }
  0x15   :  { %139 = vmatpush.bf16.msra.mxu1 %v184_v23 }
  0x18   :  { %126 = vmatpush.bf16.msra.mxu0 %v172_v28 }
  0x19   :  { %140 = vmatpush.bf16.msra.mxu1 %v176_v29 }
  0x1c   :  { %127 = vmatpush.bf16.msra.mxu0 %v164_v34 }
  0x1d   :  { %141 = vmatpush.bf16.msra.mxu1 %v168_v35 }
  0x1f   :  { %209 = vmatmul.msk.bf16.vlgmr.msra.gmra.mxu0 %vm116_vm0, %v211_v36 }
  0x20   :  { %210 = vmatmul.msk.bf16.vlgmr.msra.gmra.mxu1 %vm116_vm0, %v211_v36 }
  0x9c   :  { %v129_v40 = vpop.f32.mrf.mxu0 }
  0x9d   :  { %v130_v41 = vadd.f32 %v129_v40, %v47_v38  ;;  %v143_v42 = vpop.f32.mrf.mxu1 }
  0x9e   :  { %v144_v43 = vadd.f32 %v143_v42, %v48_v39 }
  0x9f   :  { %148 = vst [vmem:[%s300_s3] sm:$0xff] %v130_v41 }
  0xa0   :  { %149 = vst [vmem:[%s300_s3 + $0x8] sm:$0xff] %v144_v43 }
  0xa4   :  { %v131_v44 = vpop.f32.mrf.mxu0 }
  0xa5   :  { %v132_v45 = vadd.f32 %v131_v44, %v47_v38  ;;  %v145_v46 = vpop.f32.mrf.mxu1 }
  0xa6   :  { %v146_v47 = vadd.f32 %v145_v46, %v48_v39 }
  0xa7   :  { %150 = vst [vmem:[%s300_s3 + $0x10] sm:$0xff] %v132_v45 }
  0xa8   :  { %151 = vst [vmem:[%s300_s3 + $0x18] sm:$0xff] %v146_v47 }
  0xa9   :  { %156 = vsyncpa [#allocation3], 1 }

</bundles_post_ra>
